<compile_context>
chip_gen: v6e
topology: v6e:2x2x1
jax: 0.10.0
libtpu: 0.0.40
codegen_flags: <defaults>
</compile_context>

<pallas_src>
import jax
import jax.numpy as jnp
from jax import lax
from jax.experimental import pallas as pl
from jax.experimental.pallas import tpu as pltpu


def _attention_kernel(q_ref, k_ref, v_ref, bias_ref,
                      wq_ref, wk_ref, wv_ref, wo_ref, bo_ref,
                      o_ref, kp_ref, vp_ref):
    f32 = jnp.float32
    bf16 = jnp.bfloat16

    _, H, TQ, D = q_ref.shape          # q block: (1, H, TQ, D) bf16
    LK = kp_ref.shape[1]               # cached projected K/V: (H, LK, D) bf16

    # nn.Linear contraction: x @ W.T  (contract last dims of both operands)
    dn_t = (((1,), (1,)), ((), ()))
    # plain matmul (contract lhs last dim with rhs first dim)
    dn_n = (((1,), (0,)), ((), ())

            )

    # ---- K/V projections: once per batch row, cached across all q-tiles -----
    @pl.when(pl.program_id(1) == 0)
    def _():
        kf = k_ref[0].reshape(H * LK, D)                       # bf16
        vf = v_ref[0].reshape(H * LK, D)
        kp_ref[...] = lax.dot_general(
            kf, wk_ref[...], dn_t,
            preferred_element_type=f32).reshape(H, LK, D).astype(bf16)
        vp_ref[...] = lax.dot_general(
            vf, wv_ref[...], dn_t,
            preferred_element_type=f32).reshape(H, LK, D).astype(bf16)

    # ---- Q projection (1/sqrt(E) already folded into W_q by the wrapper) ----
    qf = q_ref[0].reshape(H * TQ, D)
    qp = lax.dot_general(qf, wq_ref[...], dn_t, preferred_element_type=f32)
    qp = qp.reshape(H, TQ, D).astype(bf16)

    # ---- scores (all heads), additive mask bias, unnormalised softmax -------
    s = jnp.einsum('hqd,hkd->hqk', qp, kp_ref[...],
                   preferred_element_type=f32)                  # (H, TQ, LK) f32
    s = s + bias_ref[0][None, :, :]                             # one VPU add
    s = s - jnp.max(s, axis=-1, keepdims=True)
    p = jnp.exp(s)
    l = jnp.sum(p, axis=-1, keepdims=True)                      # (H, TQ, 1)

    # ---- PV matmul on unnormalised probabilities, normalise the small result
    ho = jnp.einsum('hqk,hkd->hqd', p.astype(bf16), vp_ref[...],
                    preferred_element_type=f32)                 # (H, TQ, D)
    ho = (ho * pl.reciprocal(l, approx=False)).astype(bf16)

    # ---- fc_out: accumulate per-head (TQ, E) contributions (no (H,TQ,E) buf)
    out = lax.dot_general(ho[0], wo_ref[0], dn_n, preferred_element_type=f32)
    for h in range(1, H):
        out = out + lax.dot_general(ho[h], wo_ref[h], dn_n,
                                    preferred_element_type=f32)
    o_ref[0] = (out + bo_ref[...]).astype(o_ref.dtype)


def _vmem_budget_bytes():
    """Generation-aware VMEM budget (v7x 64 MiB vs v5e/v6e 128 MiB physical)."""
    cap = 64 * 1024 * 1024                        # conservative fallback (v7x-sized)
    try:
        cap = int(pltpu.get_tpu_info().vmem_capacity_bytes)
    except Exception:
        pass
    return min(int(cap * 0.75), 100 * 1024 * 1024)


def _estimate_vmem_bytes(tq, heads, D, Lk, E):
    """Rough per-step VMEM usage for a given q-tile (double-buffered inputs)."""
    bf, f4 = 2, 4
    kv_in = 2 * 2 * heads * Lk * D * bf           # K,V input blocks (x2 buffers)
    kv_sc = 2 * heads * Lk * D * bf               # projected K/V scratch
    q_in = 2 * heads * tq * D * bf
    b_in = 2 * tq * Lk * f4                       # mask bias
    o_out = 2 * tq * E * f4
    score = 2 * heads * tq * Lk * f4              # s and p live together
    small = 2 * heads * tq * D * f4               # qp / head_out
    wts = (3 * D * D + heads * D * E + E) * bf
    return kv_in + kv_sc + q_in + b_in + o_out + score + small + wts


def _choose_q_tile(Lq, Lk, heads, D, E, budget):
    """Largest q-tile that fits the VMEM budget; never full-Lq-unbounded, never 8."""
    lq8 = -(-Lq // 8) * 8
    cands = []
    if lq8 <= 512:
        cands.append(lq8)                          # single (padded) full-width tile
    cands += [t for t in (512, 384, 256, 128, 96, 64, 32) if t < lq8]
    for t in cands:
        if _estimate_vmem_bytes(t, heads, D, Lk, E) <= budget:
            return t
    return 32 if lq8 >= 32 else lq8                # best effort floor


def self_attention(values, keys, query, mask, params, *, heads):
    """Pallas implementation of the PyTorch SelfAttention.forward."""
    N, Lq, E = query.shape
    Lk = keys.shape[1]
    assert values.shape[1] == Lk, "key/value sequence lengths must match"
    assert E % heads == 0, "embed_size must be divisible by heads"
    D = E // heads
    wq, wk, wv, wo, bo = params
    bf16 = jnp.bfloat16

    # Head-major bf16 layout (N, H, L, D): leading-axis head indexing, half DMA bytes.
    def to_heads(x):
        n, l, _ = x.shape
        return x.reshape(n, l, heads, D).transpose(0, 2, 1, 3).astype(bf16)

    q_h = to_heads(query)
    k_h = to_heads(keys)
    v_h = to_heads(values)

    # Additive mask bias: 0 where kept, -1e20 where masked (single VPU add in-kernel).
    bias = jnp.where(mask == 0, jnp.float32(-1e20), jnp.float32(0.0))

    scale = 1.0 / (float(E) ** 0.5)
    wq_b = (wq.astype(jnp.float32) * scale).astype(bf16)   # fold 1/sqrt(E) into W_q
    wk_b = wk.astype(bf16)
    wv_b = wv.astype(bf16)
    # (H, D, E): wo_h[h, d, e] == wo[e, h*D + d]  (fc_out weight split per head)
    wo_h = wo.reshape(E, heads, D).transpose(1, 2, 0).astype(bf16)
    bo2 = bo.reshape(1, E).astype(jnp.float32)

    budget = _vmem_budget_bytes()
    tq = _choose_q_tile(Lq, Lk, heads, D, E, budget)
    n_qt = -(-Lq // tq)
    lq_pad = n_qt * tq
    if lq_pad != Lq:                                        # ragged tail: pad queries
        q_h = jnp.pad(q_h, ((0, 0), (0, 0), (0, lq_pad - Lq), (0, 0)))
        bias = jnp.pad(bias, ((0, 0), (0, lq_pad - Lq), (0, 0)))

    grid_spec = pltpu.PrefetchScalarGridSpec(
        num_scalar_prefetch=0,
        grid=(N, n_qt),
        in_specs=[
            pl.BlockSpec((1, heads, tq, D), lambda n, qi: (n, 0, qi, 0)),  # q (bf16)
            pl.BlockSpec((1, heads, Lk, D), lambda n, qi: (n, 0, 0, 0)),   # k (bf16)
            pl.BlockSpec((1, heads, Lk, D), lambda n, qi: (n, 0, 0, 0)),   # v (bf16)
            pl.BlockSpec((1, tq, Lk),       lambda n, qi: (n, qi, 0)),     # mask bias
            pl.BlockSpec((D, D),            lambda n, qi: (0, 0)),         # W_q*scale
            pl.BlockSpec((D, D),            lambda n, qi: (0, 0)),         # W_k
            pl.BlockSpec((D, D),            lambda n, qi: (0, 0)),         # W_v
            pl.BlockSpec((heads, D, E),     lambda n, qi: (0, 0, 0)),      # W_out / head
            pl.BlockSpec((1, E),            lambda n, qi: (0, 0)),         # b_out
        ],
        out_specs=pl.BlockSpec((1, tq, E), lambda n, qi: (n, qi, 0)),
        scratch_shapes=[
            pltpu.VMEM((heads, Lk, D), bf16),   # projected K (cached per batch row)
            pltpu.VMEM((heads, Lk, D), bf16),   # projected V
        ],
    )

    out = pl.pallas_call(
        _attention_kernel,
        out_shape=jax.ShapeDtypeStruct((N, lq_pad, E), query.dtype),
        grid_spec=grid_spec,
        compiler_params=pltpu.CompilerParams(
            # batch "parallel" (megacore splits disjoint K/V working sets),
            # q-tiles "arbitrary" (sequential, so the K/V scratch cache is valid).
            dimension_semantics=("parallel", "arbitrary"),
            vmem_limit_bytes=budget,
        ),
    )(q_h, k_h, v_h, bias, wq_b, wk_b, wv_b, wo_h, bo2)

    return out[:, :Lq, :] if lq_pad != Lq else out


def self_attention_reference(values, keys, query, mask, params, *, heads):
    """Pure-JAX (f32) replica of the PyTorch forward for validation."""
    wq, wk, wv, wo, bo = params
    N, Lq, E = query.shape
    D = E // heads
    v = values.reshape(N, -1, heads, D) @ wv.T
    k = keys.reshape(N, -1, heads, D) @ wk.T
    q = query.reshape(N, Lq, heads, D) @ wq.T
    atten = jnp.einsum('nqhd,nkhd->nhqk', q, k)
    atten = jnp.where(mask[:, None, :, :] == 0, jnp.float32(-1e20), atten)
    atten = jax.nn.softmax(atten / (E ** 0.5), axis=3)
    out = jnp.einsum('nhql,nlhd->nqhd', atten, v).reshape(N, Lq, E)
    return out @ wo.T + bo


if __name__ == "__main__":
    N, L, E, H = 2, 8, 32, 4
    D = E // H

    key = jax.random.PRNGKey(0)
    ks = jax.random.split(key, 8)
    values = jax.random.normal(ks[0], (N, L, E), jnp.float32)
    keys_in = jax.random.normal(ks[1], (N, L, E), jnp.float32)
    query = jax.random.normal(ks[2], (N, L, E), jnp.float32)

    # causal-style mask shared across heads (1 = keep, 0 = masked)
    mask = (jnp.arange(L)[:, None] >= jnp.arange(L)[None, :]).astype(jnp.int32)
    mask = jnp.broadcast_to(mask, (N, L, L))

    # deterministic synthetic parameters (shapes from the nn.Linear definitions)
    wq = (0.1 * jax.random.normal(ks[3], (D, D))).astype(jnp.float32)
    wk = (0.1 * jax.random.normal(ks[4], (D, D))).astype(jnp.float32)
    wv = (0.1 * jax.random.normal(ks[5], (D, D))).astype(jnp.float32)
    wo = (0.1 * jax.random.normal(ks[6], (E, E))).astype(jnp.float32)
    bo = (0.1 * jax.random.normal(ks[7], (E,))).astype(jnp.float32)
    params = (wq, wk, wv, wo, bo)

    out = self_attention(values, keys_in, query, mask, params, heads=H)
    jax.block_until_ready(out)

    ref = self_attention_reference(values, keys_in, query, mask, params, heads=H)
    assert out.shape == (N, L, E)
    # bf16 MXU operands => slightly looser tolerance vs f32 reference.
    assert jnp.allclose(out, ref, atol=2e-2, rtol=2e-2), "mismatch vs reference"

    print("KERNEL_OK")
</pallas_src>

<mosaic_0001>
module attributes {stable_mosaic.version = 11 : i64} {
  func.func @_attention_kernel(%arg0: i32, %arg1: i32, %arg2: memref<1x4x8x8xbf16, #tpu.memory_space<vmem>>, %arg3: memref<1x4x8x8xbf16, #tpu.memory_space<vmem>>, %arg4: memref<1x4x8x8xbf16, #tpu.memory_space<vmem>>, %arg5: memref<1x8x8xf32, #tpu.memory_space<vmem>>, %arg6: memref<8x8xbf16, #tpu.memory_space<vmem>>, %arg7: memref<8x8xbf16, #tpu.memory_space<vmem>>, %arg8: memref<8x8xbf16, #tpu.memory_space<vmem>>, %arg9: memref<4x8x32xbf16, #tpu.memory_space<vmem>>, %arg10: memref<1x32xf32, #tpu.memory_space<vmem>>, %arg11: memref<1x8x32xf32, #tpu.memory_space<vmem>>, %arg12: memref<4x8x8xbf16, #tpu.memory_space<vmem>>, %arg13: memref<4x8x8xbf16, #tpu.memory_space<vmem>>) attributes {dimension_semantics = [#tpu.dimension_semantics<parallel>, #tpu.dimension_semantics<arbitrary>], iteration_bounds = array<i64: 2, 1>, scalar_prefetch = 0 : i64, scratch_operands = 2 : i64, tpu.core_type = #tpu.core_type<tc>, window_params = [{transform_indices = @transform_0, window_bounds = array<i64: 1, 4, 8, 8>}, {transform_indices = @transform_1, window_bounds = array<i64: 1, 4, 8, 8>}, {transform_indices = @transform_2, window_bounds = array<i64: 1, 4, 8, 8>}, {transform_indices = @transform_3, window_bounds = array<i64: 1, 8, 8>}, {pipeline_mode = #tpu.pipeline_mode<synchronous>, transform_indices = @transform_4, window_bounds = array<i64: 8, 8>}, {pipeline_mode = #tpu.pipeline_mode<synchronous>, transform_indices = @transform_5, window_bounds = array<i64: 8, 8>}, {pipeline_mode = #tpu.pipeline_mode<synchronous>, transform_indices = @transform_6, window_bounds = array<i64: 8, 8>}, {pipeline_mode = #tpu.pipeline_mode<synchronous>, transform_indices = @transform_7, window_bounds = array<i64: 4, 8, 32>}, {pipeline_mode = #tpu.pipeline_mode<synchronous>, transform_indices = @transform_8, window_bounds = array<i64: 1, 32>}, {transform_indices = @transform_9, window_bounds = array<i64: 1, 8, 32>}]} {
    %c0_i32 = arith.constant 0 : i32
    %0 = arith.cmpi eq, %arg1, %c0_i32 : i32
    %1 = arith.extui %0 : i1 to i32
    %c0_i32_0 = arith.constant 0 : i32
    %2 = arith.cmpi ne, %1, %c0_i32_0 : i32
    scf.if %2 {
      %c0_37 = arith.constant 0 : index
      %c0_38 = arith.constant 0 : index
      %c0_39 = arith.constant 0 : index
      %c0_40 = arith.constant 0 : index
      %60 = vector.load %arg3[%c0_37, %c0_38, %c0_39, %c0_40] : memref<1x4x8x8xbf16, #tpu.memory_space<vmem>>, vector<1x4x8x8xbf16>
      %61 = vector.shape_cast %60 : vector<1x4x8x8xbf16> to vector<4x8x8xbf16>
      %62 = vector.shape_cast %61 : vector<4x8x8xbf16> to vector<32x8xbf16>
      %c0_41 = arith.constant 0 : index
      %c0_42 = arith.constant 0 : index
      %c0_43 = arith.constant 0 : index
      %c0_44 = arith.constant 0 : index
      %63 = vector.load %arg4[%c0_41, %c0_42, %c0_43, %c0_44] : memref<1x4x8x8xbf16, #tpu.memory_space<vmem>>, vector<1x4x8x8xbf16>
      %64 = vector.shape_cast %63 : vector<1x4x8x8xbf16> to vector<4x8x8xbf16>
      %65 = vector.shape_cast %64 : vector<4x8x8xbf16> to vector<32x8xbf16>
      %c0_45 = arith.constant 0 : index
      %c0_46 = arith.constant 0 : index
      %66 = vector.load %arg7[%c0_45, %c0_46] : memref<8x8xbf16, #tpu.memory_space<vmem>>, vector<8x8xbf16>
      %cst_47 = arith.constant dense<0.000000e+00> : vector<32x8xf32>
      %67 = tpu.matmul %62, %66, %cst_47 {dimension_numbers = #tpu.dot_dimension_numbers<[1], [1], [0], [0], [0, 0, 1, 0], [], []>} : vector<32x8xbf16>, vector<8x8xbf16>, vector<32x8xf32> -> vector<32x8xf32>
      %68 = vector.shape_cast %67 : vector<32x8xf32> to vector<4x8x8xf32>
      %69 = arith.truncf %68 : vector<4x8x8xf32> to vector<4x8x8xbf16>
      %c0_48 = arith.constant 0 : index
      %c0_49 = arith.constant 0 : index
      %c0_50 = arith.constant 0 : index
      %70 = vector.load %arg12[%c0_48, %c0_49, %c0_50] : memref<4x8x8xbf16, #tpu.memory_space<vmem>>, vector<4x8x8xbf16>
      tpu.vector_store %arg12[%c0_48, %c0_49, %c0_50], %69 {strides = array<i32>} : memref<4x8x8xbf16, #tpu.memory_space<vmem>>, vector<4x8x8xbf16>,
      %c0_51 = arith.constant 0 : index
      %c0_52 = arith.constant 0 : index
      %71 = vector.load %arg8[%c0_51, %c0_52] : memref<8x8xbf16, #tpu.memory_space<vmem>>, vector<8x8xbf16>
      %cst_53 = arith.constant dense<0.000000e+00> : vector<32x8xf32>
      %72 = tpu.matmul %65, %71, %cst_53 {dimension_numbers = #tpu.dot_dimension_numbers<[1], [1], [0], [0], [0, 0, 1, 0], [], []>} : vector<32x8xbf16>, vector<8x8xbf16>, vector<32x8xf32> -> vector<32x8xf32>
      %73 = vector.shape_cast %72 : vector<32x8xf32> to vector<4x8x8xf32>
      %74 = arith.truncf %73 : vector<4x8x8xf32> to vector<4x8x8xbf16>
      %c0_54 = arith.constant 0 : index
      %c0_55 = arith.constant 0 : index
      %c0_56 = arith.constant 0 : index
      %75 = vector.load %arg13[%c0_54, %c0_55, %c0_56] : memref<4x8x8xbf16, #tpu.memory_space<vmem>>, vector<4x8x8xbf16>
      tpu.vector_store %arg13[%c0_54, %c0_55, %c0_56], %74 {strides = array<i32>} : memref<4x8x8xbf16, #tpu.memory_space<vmem>>, vector<4x8x8xbf16>,
    } else {
    }
    %c0 = arith.constant 0 : index
    %c0_1 = arith.constant 0 : index
    %c0_2 = arith.constant 0 : index
    %c0_3 = arith.constant 0 : index
    %3 = vector.load %arg2[%c0, %c0_1, %c0_2, %c0_3] : memref<1x4x8x8xbf16, #tpu.memory_space<vmem>>, vector<1x4x8x8xbf16>
    %4 = vector.shape_cast %3 : vector<1x4x8x8xbf16> to vector<4x8x8xbf16>
    %5 = vector.shape_cast %4 : vector<4x8x8xbf16> to vector<32x8xbf16>
    %c0_4 = arith.constant 0 : index
    %c0_5 = arith.constant 0 : index
    %6 = vector.load %arg6[%c0_4, %c0_5] : memref<8x8xbf16, #tpu.memory_space<vmem>>, vector<8x8xbf16>
    %cst = arith.constant dense<0.000000e+00> : vector<32x8xf32>
    %7 = tpu.matmul %5, %6, %cst {dimension_numbers = #tpu.dot_dimension_numbers<[1], [1], [0], [0], [0, 0, 1, 0], [], []>} : vector<32x8xbf16>, vector<8x8xbf16>, vector<32x8xf32> -> vector<32x8xf32>
    %8 = vector.shape_cast %7 : vector<32x8xf32> to vector<4x8x8xf32>
    %9 = arith.truncf %8 : vector<4x8x8xf32> to vector<4x8x8xbf16>
    %c0_6 = arith.constant 0 : index
    %c0_7 = arith.constant 0 : index
    %c0_8 = arith.constant 0 : index
    %10 = vector.load %arg12[%c0_6, %c0_7, %c0_8] : memref<4x8x8xbf16, #tpu.memory_space<vmem>>, vector<4x8x8xbf16>
    "tpu.trace_start"() <{level = 10 : i32, message = "hqd,hkd->hqk"}> : () -> ()
    %cst_9 = arith.constant dense<0.000000e+00> : vector<4x8x8xf32>
    %11 = tpu.matmul %9, %10, %cst_9 {dimension_numbers = #tpu.dot_dimension_numbers<[2], [2], [1], [1], [0, 0, 0, 1, 1, 1], [0], [0]>} : vector<4x8x8xbf16>, vector<4x8x8xbf16>, vector<4x8x8xf32> -> vector<4x8x8xf32>
    "tpu.trace_stop"() : () -> ()
    %c0_10 = arith.constant 0 : index
    %c0_11 = arith.constant 0 : index
    %c0_12 = arith.constant 0 : index
    %12 = vector.load %arg5[%c0_10, %c0_11, %c0_12] : memref<1x8x8xf32, #tpu.memory_space<vmem>>, vector<1x8x8xf32>
    %13 = vector.shape_cast %12 : vector<1x8x8xf32> to vector<8x8xf32>
    %14 = vector.shape_cast %13 : vector<8x8xf32> to vector<1x8x8xf32>
    %15 = vector.broadcast %14 : vector<1x8x8xf32> to vector<4x8x8xf32>
    %16 = arith.addf %11, %15 : vector<4x8x8xf32>
    %cst_13 = arith.constant dense<0xFF800000> : vector<4x8xf32>
    %17 = vector.multi_reduction <maximumf>, %16, %cst_13 [2] : vector<4x8x8xf32> to vector<4x8xf32>
    %18 = vector.shape_cast %17 : vector<4x8xf32> to vector<4x8x1xf32>
    %19 = vector.broadcast %18 : vector<4x8x1xf32> to vector<4x8x8xf32>
    %20 = arith.subf %16, %19 : vector<4x8x8xf32>
    %21 = math.exp %20 : vector<4x8x8xf32>
    %cst_14 = arith.constant dense<0.000000e+00> : vector<4x8xf32>
    %22 = vector.multi_reduction <add>, %21, %cst_14 [2] : vector<4x8x8xf32> to vector<4x8xf32>
    %23 = vector.shape_cast %22 : vector<4x8xf32> to vector<4x8x1xf32>
    %24 = arith.truncf %21 : vector<4x8x8xf32> to vector<4x8x8xbf16>
    %c0_15 = arith.constant 0 : index
    %c0_16 = arith.constant 0 : index
    %c0_17 = arith.constant 0 : index
    %25 = vector.load %arg13[%c0_15, %c0_16, %c0_17] : memref<4x8x8xbf16, #tpu.memory_space<vmem>>, vector<4x8x8xbf16>
    "tpu.trace_start"() <{level = 10 : i32, message = "hqk,hkd->hqd"}> : () -> ()
    %cst_18 = arith.constant dense<0.000000e+00> : vector<4x8x8xf32>
    %26 = tpu.matmul %24, %25, %cst_18 {dimension_numbers = #tpu.dot_dimension_numbers<[2], [1], [1], [2], [0, 0, 0, 1, 1, 2], [0], [0]>} : vector<4x8x8xbf16>, vector<4x8x8xbf16>, vector<4x8x8xf32> -> vector<4x8x8xf32>
    "tpu.trace_stop"() : () -> ()
    %27 = tpu.reciprocal %23 : vector<4x8x1xf32> -> vector<4x8x1xf32>
    %28 = vector.broadcast %27 : vector<4x8x1xf32> to vector<4x8x8xf32>
    %29 = arith.mulf %26, %28 : vector<4x8x8xf32>
    %30 = arith.truncf %29 : vector<4x8x8xf32> to vector<4x8x8xbf16>
    %31 = vector.extract_strided_slice %30 {offsets = [0, 0, 0], sizes = [1, 8, 8], strides = [1, 1, 1]} : vector<4x8x8xbf16> to vector<1x8x8xbf16>
    %32 = vector.shape_cast %31 : vector<1x8x8xbf16> to vector<8x8xbf16>
    %c0_19 = arith.constant 0 : index
    %c0_20 = arith.constant 0 : index
    %c0_21 = arith.constant 0 : index
    %33 = vector.load %arg9[%c0_19, %c0_20, %c0_21] : memref<4x8x32xbf16, #tpu.memory_space<vmem>>, vector<1x8x32xbf16>
    %34 = vector.shape_cast %33 : vector<1x8x32xbf16> to vector<8x32xbf16>
    %cst_22 = arith.constant dense<0.000000e+00> : vector<8x32xf32>
    %35 = tpu.matmul %32, %34, %cst_22 {dimension_numbers = #tpu.dot_dimension_numbers<[1], [0], [0], [1], [0, 0, 1, 1], [], []>} : vector<8x8xbf16>, vector<8x32xbf16>, vector<8x32xf32> -> vector<8x32xf32>
    %36 = vector.extract_strided_slice %30 {offsets = [1, 0, 0], sizes = [1, 8, 8], strides = [1, 1, 1]} : vector<4x8x8xbf16> to vector<1x8x8xbf16>
    %37 = vector.shape_cast %36 : vector<1x8x8xbf16> to vector<8x8xbf16>
    %c1 = arith.constant 1 : index
    %c0_23 = arith.constant 0 : index
    %c0_24 = arith.constant 0 : index
    %38 = vector.load %arg9[%c1, %c0_23, %c0_24] : memref<4x8x32xbf16, #tpu.memory_space<vmem>>, vector<1x8x32xbf16>
    %39 = vector.shape_cast %38 : vector<1x8x32xbf16> to vector<8x32xbf16>
    %cst_25 = arith.constant dense<0.000000e+00> : vector<8x32xf32>
    %40 = tpu.matmul %37, %39, %cst_25 {dimension_numbers = #tpu.dot_dimension_numbers<[1], [0], [0], [1], [0, 0, 1, 1], [], []>} : vector<8x8xbf16>, vector<8x32xbf16>, vector<8x32xf32> -> vector<8x32xf32>
    %41 = arith.addf %35, %40 : vector<8x32xf32>
    %42 = vector.extract_strided_slice %30 {offsets = [2, 0, 0], sizes = [1, 8, 8], strides = [1, 1, 1]} : vector<4x8x8xbf16> to vector<1x8x8xbf16>
    %43 = vector.shape_cast %42 : vector<1x8x8xbf16> to vector<8x8xbf16>
    %c2 = arith.constant 2 : index
    %c0_26 = arith.constant 0 : index
    %c0_27 = arith.constant 0 : index
    %44 = vector.load %arg9[%c2, %c0_26, %c0_27] : memref<4x8x32xbf16, #tpu.memory_space<vmem>>, vector<1x8x32xbf16>
    %45 = vector.shape_cast %44 : vector<1x8x32xbf16> to vector<8x32xbf16>
    %cst_28 = arith.constant dense<0.000000e+00> : vector<8x32xf32>
    %46 = tpu.matmul %43, %45, %cst_28 {dimension_numbers = #tpu.dot_dimension_numbers<[1], [0], [0], [1], [0, 0, 1, 1], [], []>} : vector<8x8xbf16>, vector<8x32xbf16>, vector<8x32xf32> -> vector<8x32xf32>
    %47 = arith.addf %41, %46 : vector<8x32xf32>
    %48 = vector.extract_strided_slice %30 {offsets = [3, 0, 0], sizes = [1, 8, 8], strides = [1, 1, 1]} : vector<4x8x8xbf16> to vector<1x8x8xbf16>
    %49 = vector.shape_cast %48 : vector<1x8x8xbf16> to vector<8x8xbf16>
    %c3 = arith.constant 3 : index
    %c0_29 = arith.constant 0 : index
    %c0_30 = arith.constant 0 : index
    %50 = vector.load %arg9[%c3, %c0_29, %c0_30] : memref<4x8x32xbf16, #tpu.memory_space<vmem>>, vector<1x8x32xbf16>
    %51 = vector.shape_cast %50 : vector<1x8x32xbf16> to vector<8x32xbf16>
    %cst_31 = arith.constant dense<0.000000e+00> : vector<8x32xf32>
    %52 = tpu.matmul %49, %51, %cst_31 {dimension_numbers = #tpu.dot_dimension_numbers<[1], [0], [0], [1], [0, 0, 1, 1], [], []>} : vector<8x8xbf16>, vector<8x32xbf16>, vector<8x32xf32> -> vector<8x32xf32>
    %53 = arith.addf %47, %52 : vector<8x32xf32>
    %c0_32 = arith.constant 0 : index
    %c0_33 = arith.constant 0 : index
    %54 = vector.load %arg10[%c0_32, %c0_33] : memref<1x32xf32, #tpu.memory_space<vmem>>, vector<1x32xf32>
    %55 = vector.broadcast %54 : vector<1x32xf32> to vector<8x32xf32>
    %56 = arith.addf %53, %55 : vector<8x32xf32>
    %c0_34 = arith.constant 0 : index
    %c0_35 = arith.constant 0 : index
    %c0_36 = arith.constant 0 : index
    %57 = vector.load %arg11[%c0_34, %c0_35, %c0_36] : memref<1x8x32xf32, #tpu.memory_space<vmem>>, vector<1x8x32xf32>
    %58 = vector.shape_cast %57 : vector<1x8x32xf32> to vector<8x32xf32>
    %59 = vector.shape_cast %56 : vector<8x32xf32> to vector<1x8x32xf32>
    tpu.vector_store %arg11[%c0_34, %c0_35, %c0_36], %59 {strides = array<i32>} : memref<1x8x32xf32, #tpu.memory_space<vmem>>, vector<1x8x32xf32>,
    return
  }
  func.func @transform_0(%arg0: i32, %arg1: i32) -> (i32, i32, i32, i32) {
    %c0_i32 = arith.constant 0 : i32
    %c0_i32_0 = arith.constant 0 : i32
    %c0_i32_1 = arith.constant 0 : i32
    return %arg0, %c0_i32, %arg1, %c0_i32_0 : i32, i32, i32, i32
  }
  func.func @transform_1(%arg0: i32, %arg1: i32) -> (i32, i32, i32, i32) {
    %c0_i32 = arith.constant 0 : i32
    %c0_i32_0 = arith.constant 0 : i32
    %c0_i32_1 = arith.constant 0 : i32
    %c0_i32_2 = arith.constant 0 : i32
    return %arg0, %c0_i32, %c0_i32_0, %c0_i32_1 : i32, i32, i32, i32
  }
  func.func @transform_2(%arg0: i32, %arg1: i32) -> (i32, i32, i32, i32) {
    %c0_i32 = arith.constant 0 : i32
    %c0_i32_0 = arith.constant 0 : i32
    %c0_i32_1 = arith.constant 0 : i32
    %c0_i32_2 = arith.constant 0 : i32
    return %arg0, %c0_i32, %c0_i32_0, %c0_i32_1 : i32, i32, i32, i32
  }
  func.func @transform_3(%arg0: i32, %arg1: i32) -> (i32, i32, i32) {
    %c0_i32 = arith.constant 0 : i32
    %c0_i32_0 = arith.constant 0 : i32
    return %arg0, %arg1, %c0_i32 : i32, i32, i32
  }
  func.func @transform_4(%arg0: i32, %arg1: i32) -> (i32, i32) {
    %c0_i32 = arith.constant 0 : i32
    %c0_i32_0 = arith.constant 0 : i32
    %c0_i32_1 = arith.constant 0 : i32
    return %c0_i32, %c0_i32_0 : i32, i32
  }
  func.func @transform_5(%arg0: i32, %arg1: i32) -> (i32, i32) {
    %c0_i32 = arith.constant 0 : i32
    %c0_i32_0 = arith.constant 0 : i32
    %c0_i32_1 = arith.constant 0 : i32
    return %c0_i32, %c0_i32_0 : i32, i32
  }
  func.func @transform_6(%arg0: i32, %arg1: i32) -> (i32, i32) {
    %c0_i32 = arith.constant 0 : i32
    %c0_i32_0 = arith.constant 0 : i32
    %c0_i32_1 = arith.constant 0 : i32
    return %c0_i32, %c0_i32_0 : i32, i32
  }
  func.func @transform_7(%arg0: i32, %arg1: i32) -> (i32, i32, i32) {
    %c0_i32 = arith.constant 0 : i32
    %c0_i32_0 = arith.constant 0 : i32
    %c0_i32_1 = arith.constant 0 : i32
    %c0_i32_2 = arith.constant 0 : i32
    return %c0_i32, %c0_i32_0, %c0_i32_1 : i32, i32, i32
  }
  func.func @transform_8(%arg0: i32, %arg1: i32) -> (i32, i32) {
    %c0_i32 = arith.constant 0 : i32
    %c0_i32_0 = arith.constant 0 : i32
    %c0_i32_1 = arith.constant 0 : i32
    return %c0_i32, %c0_i32_0 : i32, i32
  }
  func.func @transform_9(%arg0: i32, %arg1: i32) -> (i32, i32, i32) {
    %c0_i32 = arith.constant 0 : i32
    %c0_i32_0 = arith.constant 0 : i32
    return %arg0, %arg1, %c0_i32 : i32, i32, i32
  }
}

</mosaic_0001>

<bundles_post_ra>
// kernel: tpu_custom_call.1
= control target key start
LH: loop header
LB: loop body
LE: loop exit
PB: predicated region body
PF: predicated region fallthrough
CT: control target
= control target key end

     0   :  { %s2590_s0 = inlined_call_operand.hbm [shape: bf16[2,4,8,8], index: 0, kind: input, shape index: {}]   ;;  %s2591_s1 = inlined_call_operand.hbm [shape: bf16[2,4,8,8], index: 1, kind: input, shape index: {}]   ;;  %s2592_s2 = inlined_call_operand.hbm [shape: bf16[2,4,8,8], index: 2, kind: input, shape index: {}]   ;;  %s2593_s3 = inlined_call_operand.hbm [shape: f32[2,8,8], index: 3, kind: input, shape index: {}]   ;;  %s2594_s4 = inlined_call_operand.vmem [shape: bf16[8,8], index: 4, kind: input, shape index: {}]   ;;  %s2595_s5 = inlined_call_operand.vmem [shape: bf16[8,8], index: 5, kind: input, shape index: {}]   ;;  %s2596_s6 = inlined_call_operand.hbm [shape: bf16[8,8], index: 6, kind: input, shape index: {}]   ;;  %s2597_s7 = inlined_call_operand.hbm [shape: bf16[4,8,32], index: 7, kind: input, shape index: {}]   ;;  %s2598_s8 = inlined_call_operand.vmem [shape: f32[1,32], index: 8, kind: input, shape index: {}]   ;;  %s2599_s9 = inlined_call_operand.hbm [shape: f32[2,8,32], index: 9, kind: output, shape index: {}]  }
   0x1   :  { %2610 = sst [smem:[#allocation29_spill]] %s2591_s1 }
   0x2   :  { %2611 = sst [smem:[#allocation30_spill]] %s2594_s4 }
   0x3   :  { %2612 = sst [smem:[#allocation31_spill]] %s2596_s6 }
   0x4   :  { %2613 = sst [smem:[#allocation32_spill]] %s2598_s8 }
   0x5   :  { %2614 = sst [smem:[#allocation33_spill]] %s2599_s9 }
   0x6   :  { %14 = vsyncpa [#allocation5], 0 }
   0x7   :  { %16 = vsyncpa [#allocation5 + $0x1], 0 }
   0x8   :  { %17 = vsyncpa [#allocation8], 0 }
   0x9   :  { %19 = vsyncpa [#allocation8 + $0x1], 0 }
   0xa   :  { %20 = vsyncpa [#allocation11], 0 }
   0xb   :  { %22 = vsyncpa [#allocation11 + $0x1], 0 }
   0xc   :  { %23 = vsyncpa [#allocation14], 0 }
   0xd   :  { %24 = vsyncpa [#allocation6], 0 }
   0xe   :  { %26 = vsyncpa [#allocation6 + $0x1], 0  ;;  %s2204_s30 = smov 0   ;;  %s2206_s10 = smov 0  }
   0xf   :  { %s2208_s11 = smov 0   ;;  %s2210_s12 = smov 0  }
  0x10   :  { %s2212_s13 = smov 0   ;;  %s2214_s14 = smov 0  }
  0x11 LB: > { %2615 = sst [smem:[#allocation22_spill]] %s2121_s30  ;;  %s2235_s15 = sadd.s32 4294967295, %s2141_s14   ;;  %s2141_s14 = sphi %s2214_s14, %s32_s14   ;;  %s2137_s13 = sphi %s2212_s13, %s2649_s13   ;;  %s2133_s12 = sphi %s2210_s12, %s2648_s12   ;;  %s2129_s11 = sphi %s2208_s11, %s2644_s11   ;;  %s2125_s10 = sphi %s2206_s10, %s2647_s10   ;;  %s2121_s30 = sphi %s2204_s30, %s2646_s30  }
  0x12   : > { %2616 = sst [smem:[#allocation23_spill]] %s2129_s11  ;;  %s1575_s16 = sadd.s32 4294967294, %s2141_s14  }
  0x13   : > { %2617 = sst [smem:[#allocation24_spill]] %s2133_s12  ;;  %s53_s17 = sadd.s32 1, %s2129_s11 }
  0x14   : > { %p60_p0 = scmp.ne.s32.totalorder %s2129_s11, %s2125_s10  ;;  %p61_p1 = scmp.eq.s32.totalorder %s2141_s14, 0 }
  0x15   : > { %p66_p2 = scmp.ne.s32.totalorder %s2125_s10, %s2121_s30  ;;  %p67_p3 = scmp.eq.s32.totalorder %s2235_s15, 0 }
  0x16   : > { %p277_p4 = scmp.eq.s32.totalorder %s2235_s15, 1  ;;  %p2246_p5 = por %p61_p1, %p60_p0 }
  0x17   : > { %p283_p6 = scmp.eq.s32.totalorder %s1575_s16, 1  ;;  %p2252_p7 = por %p67_p3, %p66_p2 }
  0x18   : > { %p2256_p8 = por %p277_p4, %p60_p0  ;;  %p1576_p10 = scmp.ge.s32.totalorder %s2141_s14, 1 }
  0x19   : > { %s2619_s19 = scalar_select %p2252_p7, 1, 0 }
  0x1a   : > { %s2620_s20 = scalar_select %p2256_p8, 1, 0 }
  0x1b   : > { %p2260_p9 = por %p283_p6, %p66_p2  ;;  %p290_p11 = scmp.lt.s32.totalorder %s2141_s14, 3 }
  0x1c   : > { %2621 = sst [smem:[#allocation25_spill]] %s2620_s20  ;;  %s2143_s23 = smov [#allocation12]  }
  0x1d   : > { %s2622_s21 = scalar_select %p2260_p9, 1, 0 }
  0x1e   : > { %p2267_p13 = pnand %p1576_p10, %p290_p11  ;;  %s309_s24 = sshll.u32 %s2143_s23, 4  ;;  %s310_s24 = int_to_ptr.vmem [resolvable:$true] %s309_s24 }
  0x1f   : > { %2623 = sst [smem:[#allocation26_spill]] %s2622_s21  ;;  %p1801_p1 = scmp.lt.s32.totalorder %s2141_s14, 2 }
  0x20   : > { %p1775_p0 = pneg %p2267_p13  ;;  %s44_s27 = sadd.s32 1, %s2137_s13 }
  0x21   : > { %p2276_p4 = pnand %p1801_p1, %p2246_p5  ;;  %p46_p6 = scmp.ge.s32.totalorder %s44_s27, 2 }
  0x22   : > { %p2282_p2 = pnand %p1775_p0, %p67_p3  ;;  %s1892_s28 = scalar_lea.vmem %s310_s24, 64 }
  0x23   : > { %p1893_p11 = scmp.ne.s32.totalorder %s310_s24, %s1892_s28  ;;  %p1900_p1 = scmp.lt.s32.totalorder %s310_s24, %s310_s24 }
  0x24   : > { %p1883_p10 = pneg %p2282_p2  ;;  %p1901_p9 = scmp.lt.s32.totalorder %s1892_s28, %s1892_s28 }
  0x26   : > { %p1895_p12 = pnand %p1893_p11, %p1883_p10  ;;  %p1902_p8 = por %p1901_p9, %p1900_p1 }
  0x28   : > { %p1896_p5 = pneg %p1895_p12 }
  0x2a   : > { %p1903_p7 = pnand %p1902_p8, %p1896_p5 }
  0x2c   : > { %1906 = shalt.err (!%p1903_p7)
}
  0x2d   : > { %s2627_s6 = sld [smem:[#allocation31_spill]]  ;;  %s2651_s27 = smov (%p46_p6, %s44_s27), 0 }
  0x2e   : > { %2628 = sst [smem:[#allocation27_spill]] %s2651_s27  ;;  %s2300_s18 = sand.u32 1, %s2129_s11  }
  0x2f   : > { %s48_s23 = ssub.s32 %s2137_s13, %s2651_s27  ;;  %s2305_s28 = sshll.u32 %s2300_s18, 4 }
  0x30   : > { %p51_p7 = scmp.eq.s32.totalorder %s48_s23, 0  ;;  %s2308_s29 = sshll.u32 %s2137_s13, 8 }
  0x31   : > { %s2608_s16 = sand.u32 1, %s2141_s14   ;;  %s2630_s1 = sld [smem:[#allocation29_spill]] }
  0x32   : > { %s2314_s21 = scalar_select %p51_p7, %s2129_s11, %s53_s17  }
  0x33   : > { %1778 = dma.hbm_to_vmem [thread:$0]  (!%p2282_p2), %s2627_s6, 64, %s310_s24, [#allocation11]  }
  0x34   : > { %2629 = sst [smem:[#allocation28_spill]] %s2314_s21  ;;  %s362_s9 = scalar_lea.vmem [#allocation7], %s2305_s28 }
  0x35   : > { %s369_s20 = sshll.u32 %s362_s9, 4  ;;  %s2144_s27 = smov [#allocation13]   ;;  %s370_s20 = int_to_ptr.vmem [resolvable:$true] %s369_s20 }
  0x36   : > { %s319_s8 = sshll.u32 %s2144_s27, 4  ;;  %s2323_s12 = scalar_lea.sflag [#allocation8], %s2608_s16  ;;  %s320_s8 = int_to_ptr.vmem [resolvable:$true] %s319_s8 }
  0x37   : > { %s368_s30 = scalar_lea.hbm %s2630_s1, %s2308_s29  ;;  %p1909_p8 = pneg %p2276_p4 }
  0x38   : > { %s1920_s23 = scalar_lea.vmem %s370_s20, 256  ;;  %s2145_s17 = smov [#allocation7]  }
  0x39   : > { %p1921_p9 = scmp.ne.s32.totalorder %s370_s20, %s1920_s23  ;;  %s1925_s21 = sshll.u32 %s2145_s17, 4  ;;  %s1926_s21 = int_to_ptr.vmem [resolvable:$false] %s1925_s21 }
  0x3a   : > { %s1927_s6 = scalar_lea.vmem %s1926_s21, 512  ;;  %p1928_p6 = scmp.lt.s32.totalorder %s370_s20, %s1926_s21 }
  0x3b   : > { %p1923_p12 = pnand %p1921_p9, %p1909_p8  ;;  %p1929_p11 = scmp.lt.s32.totalorder %s1927_s6, %s1920_s23 }
  0x3d   : > { %p1924_p0 = pneg %p1923_p12  ;;  %p1930_p5 = por %p1929_p11, %p1928_p6 }
  0x3f   : > { %p1931_p1 = pnand %p1930_p5, %p1924_p0 }
  0x41   : > { %1934 = shalt.err (!%p1931_p1)
}
  0x42   : > { %s2146_s9 = smov 64   ;;  %s2147_s27 = smov 4  }
  0x43   : > { %1788 = dma.hbm_to_vmem [thread:$0]  (!%p2276_p4), %s368_s30, 256, %s370_s20, %s2323_s12, %s2146_s9, %s2146_s9, %s2147_s27  }
  0x44   : > { %s1946_s24 = scalar_lea.vmem %s320_s8, 256  ;;  %p1954_p6 = scmp.lt.s32.totalorder %s320_s8, %s320_s8 }
  0x45   : > { %p1947_p7 = scmp.ne.s32.totalorder %s320_s8, %s1946_s24  ;;  %p1955_p0 = scmp.lt.s32.totalorder %s1946_s24, %s1946_s24 }
  0x47   : > { %p1949_p9 = pnand %p1947_p7, %p1883_p10  ;;  %p1956_p11 = por %p1955_p0, %p1954_p6 }
  0x49   : > { %p1950_p12 = pneg %p1949_p9 }
  0x4b   : > { %p1957_p5 = pnand %p1956_p11, %p1950_p12 }
  0x4d   : > { %1960 = shalt.err (!%p1957_p5)
}
  0x4e   : > { %1781 = dma.hbm_to_vmem [thread:$0]  (!%p2282_p2), %s2597_s7, 256, %s320_s8, [#allocation14], %s2146_s9, %s2146_s9, %s2147_s27  }
  0x4f   : > { %s347_s17 = scalar_lea.hbm %s2590_s0, %s2308_s29  ;;  %s340_s6 = scalar_lea.vmem [#allocation4], %s2305_s28 }
  0x50   : > { %s348_s24 = sshll.u32 %s340_s6, 4  ;;  %s389_s1 = scalar_lea.hbm %s2592_s2, %s2308_s29  ;;  %s349_s24 = int_to_ptr.vmem [resolvable:$true] %s348_s24 }
  0x51   : > { %s337_s11 = scalar_lea.sflag [#allocation5], %s2300_s18  ;;  %s1974_s4 = scalar_lea.vmem %s349_s24, 256 }
  0x52   : > { %p1975_p10 = scmp.ne.s32.totalorder %s349_s24, %s1974_s4  ;;  %s2148_s21 = smov [#allocation4]  }
  0x53   : > { %s1979_s8 = sshll.u32 %s2148_s21, 4  ;;  %s1980_s8 = int_to_ptr.vmem [resolvable:$false] %s1979_s8 }
  0x54   : > { %p1977_p1 = pnand %p1975_p10, %p1909_p8  ;;  %s1981_s23 = scalar_lea.vmem %s1980_s8, 512 }
  0x55   : > { %p1982_p2 = scmp.lt.s32.totalorder %s349_s24, %s1980_s8  ;;  %p1983_p9 = scmp.lt.s32.totalorder %s1981_s23, %s1974_s4 }
  0x56   : > { %p1978_p7 = pneg %p1977_p1 }
  0x57   : > { %p1984_p12 = por %p1983_p9, %p1982_p2 }
  0x59   : > { %p1985_p6 = pnand %p1984_p12, %p1978_p7 }
  0x5b   : > { %1988 = shalt.err (!%p1985_p6)
}
  0x5c   : > { %1785 = dma.hbm_to_vmem [thread:$0]  (!%p2276_p4), %s347_s17, 256, %s349_s24, %s337_s11, %s2146_s9, %s2146_s9, %s2147_s27  }
  0x5d   : > { %s383_s16 = scalar_lea.vmem [#allocation9], %s2305_s28  ;;  %s1589_s20 = sshll.u32 %s2300_s18, 3 }
  0x5e   : > { %s390_s30 = sshll.u32 %s383_s16, 4  ;;  %s2149_s4 = smov [#allocation9]   ;;  %s391_s30 = int_to_ptr.vmem [resolvable:$true] %s390_s30 }
  0x5f   : > { %s2002_s6 = scalar_lea.vmem %s391_s30, 256  ;;  %s2007_s26 = sshll.u32 %s2149_s4, 4  ;;  %s2008_s26 = int_to_ptr.vmem [resolvable:$false] %s2007_s26 }
  0x60   : > { %p2003_p0 = scmp.ne.s32.totalorder %s391_s30, %s2002_s6  ;;  %s2009_s21 = scalar_lea.vmem %s2008_s26, 512 }
  0x61   : > { %p2010_p10 = scmp.lt.s32.totalorder %s391_s30, %s2008_s26  ;;  %p2011_p1 = scmp.lt.s32.totalorder %s2009_s21, %s2002_s6 }
  0x62   : > { %p2005_p11 = pnand %p2003_p0, %p1909_p8 }
  0x63   : > { %p2012_p7 = por %p2011_p1, %p2010_p10 }
  0x64   : > { %p2006_p5 = pneg %p2005_p11 }
  0x66   : > { %p2013_p2 = pnand %p2012_p7, %p2006_p5 }
  0x68   : > { %2016 = shalt.err (!%p2013_p2)
}
  0x69   : > { %1791 = dma.hbm_to_vmem [thread:$0]  (!%p2276_p4), %s389_s1, 256, %s391_s30, %s2323_s12, %s2146_s9, %s2146_s9, %s2147_s27  }
  0x6a   : > { %s1590_s28 = sshll.u32 %s2137_s13, 7  ;;  %s404_s23 = scalar_lea.vmem [#allocation10], %s1589_s20 }
  0x6b   : > { %s410_s8 = scalar_lea.hbm %s2593_s3, %s1590_s28  ;;  %s412_s16 = sshll.u32 %s404_s23, 4  ;;  %s413_s16 = int_to_ptr.vmem [resolvable:$true] %s412_s16 }
  0x6c   : > { %s2631_s6 = sand.u32 1, %s2141_s14   ;;  %s2030_s26 = scalar_lea.vmem %s413_s16, 128 }
  0x6d   : > { %s401_s4 = scalar_lea.sflag [#allocation11], %s2631_s6  ;;  %p2031_p9 = scmp.ne.s32.totalorder %s413_s16, %s2030_s26 }
  0x6e   : > { %s2150_s29 = smov [#allocation10]  }
  0x6f   : > { %p2033_p12 = pnand %p2031_p9, %p1909_p8  ;;  %s2035_s21 = sshll.u32 %s2150_s29, 4  ;;  %s2036_s21 = int_to_ptr.vmem [resolvable:$false] %s2035_s21 }
  0x70   : > { %s2037_s1 = scalar_lea.vmem %s2036_s21, 256  ;;  %p2038_p0 = scmp.lt.s32.totalorder %s413_s16, %s2036_s21 }
  0x71   : > { %p2034_p6 = pneg %p2033_p12  ;;  %p2039_p11 = scmp.lt.s32.totalorder %s2037_s1, %s2030_s26 }
  0x73   : > { %p2040_p5 = por %p2039_p11, %p2038_p0 }
  0x75   : > { %p2041_p10 = pnand %p2040_p5, %p2034_p6 }
  0x77   : > { %2044 = shalt.err (!%p2041_p10)
}
  0x78   : > { %1794 = dma.hbm_to_vmem [thread:$0]  (!%p2276_p4), %s410_s8, 128, %s413_s16, %s401_s4  }
  0x79   : > { %421 = sbr.rel (%p2267_p13) target bundleno = 1134 (0x46e), region = 56  ;;  %s2395_s12 = sand.u32 (!%p2267_p13), 1, %s2125_s10  }
  0x7a   : > { %s2398_s9 = sshll.u32 (!%p2267_p13), %s2395_s12, 4  ;;  %s424_s27 = scalar_lea.sflag (!%p2267_p13), [#allocation5], %s2395_s12 }
  0x7b   : > { %s427_s30 = scalar_lea.vmem (!%p2267_p13), [#allocation4], %s2398_s9  ;;  %p2632_p8 = scmp.ne.s32.totalorder (!%p2267_p13), %s2619_s19, 0 }
  0x7e   : > { %2096 = dma.done.wait (%p2632_p8), %s424_s27, 256  }
  0x7f   : > { %2098 = vsyncadd (%p2632_p8), %s424_s27, 4294967040  ;;  %s432_s22 = sand.u32 1, %s2235_s15   ;;  %s436_s20 = scalar_lea.vmem [#allocation7], %s2398_s9 }
  0x80   : > { %s433_s25 = scalar_lea.sflag [#allocation8], %s432_s22 }
  0x81   : > { %2100 = dma.done.wait (%p2632_p8), %s433_s25, 512  }
  0x82   : > { %2102 = vsyncadd (%p2632_p8), %s433_s25, 4294966784  ;;  %s1595_s11 = sshll.u32 %s2395_s12, 3  ;;  %s445_s18 = scalar_lea.vmem [#allocation9], %s2398_s9 }
  0x83   : > { %s451_s28 = scalar_lea.sflag [#allocation11], %s432_s22  ;;  %s2416_s17 = scalar_lea.vmem [#allocation10], %s1595_s11 }
  0x84   : > { %2104 = dma.done.wait (%p2632_p8), %s451_s28, 128  }
  0x85   : > { %2106 = vsyncadd (%p2632_p8), %s451_s28, 4294967168 }
  0x86   : > { %2108 = dma.done.wait (%p67_p3), [#allocation11], 64  }
  0x87   : > { %2110 = vsyncadd (%p67_p3), [#allocation11], 4294967232 }
  0x88   : > { %2112 = dma.done.wait (%p67_p3), [#allocation14], 256  }
  0x89   : > { %2114 = vsyncadd (%p67_p3), [#allocation14], 4294967040  ;;  %vm536_vm0 = vcmask 64512   ;;  %v525_v0 = vld [vmem:[%s2595_s5] sm:$0xf]  ;;  %s2633_s16 = sld [smem:[#allocation30_spill]] }
  0x8a   : > { %1754 = vmatprep.subr.msk.bf16.mxu0 %vm536_vm0, %v525_v0  ;;  %v544_v1 = vsel %vm536_vm0, %v525_v0, 0  ;;  %v1859_v2 = vld [vmem:[%s436_s20] sm:$0xff]   ;;  %v1860_v4 = vld [vmem:[%s436_s20 + $0x8] sm:$0xff]   ;;  %v2151_v12 = vmov 0.0   ;;  %vm2152_vm1 = vmmov 0   ;;  %vm599_vm2 = vcmask 60416  }
  0x8b   : > { %1665 = vmatpush3.bf16.xpose.msra.mxu0 %v544_v1  ;;  %1666 = vmatprep.mubr.msk.bf16.mxu0 %vm536_vm0, %v1859_v2  ;;  %v1861_v5 = vld [vmem:[%s427_s30] sm:$0xff]   ;;  %v1862_v7 = vld [vmem:[%s427_s30 + $0x8] sm:$0xff]   ;;  %vm995_vm3 = vcmask 1043456   ;;  %s2634_s15 = sld [smem:[#allocation24_spill]]  ;;  %s511_s1 = scalar_lea.vmem [#allocation15], %s1595_s11  ;;  %vm1390_vm4 = vcmask 261120  }
  0x8c   : > { %v604_v8 = vld [vmem:[#allocation12] sm:$0xf]  ;;  %v1864_v11 = vld [vmem:[%s445_s18 + $0x8] sm:$0xff]   ;;  %v763_v49 = vld [vmem:[%s2416_s17] sm:$0xff]  ;;  %s2635_s26 = sld [smem:[#allocation32_spill]]  ;;  %s1407_s9 = sshll.u32 %s511_s1, 4  ;;  %s2544_s9 = int_to_ptr.vmem [resolvable:$true] %s1407_s9 }
  0x8d   : > { %1755 = vmatprep.subr.msk.bf16.mxu1 %vm536_vm0, %v604_v8  ;;  %v622_v9 = vsel %vm536_vm0, %v604_v8, 0  ;;  %v1863_v10 = vld [vmem:[%s445_s18] sm:$0xff]   ;;  %s2636_s21 = sld [smem:[#allocation25_spill]]  ;;  %s1393_s20 = scalar_lea.sflag [#allocation6], %s2395_s12 }
  0x8e   : > { %1671 = vmatpush3.bf16.xpose.msra.mxu1 %v622_v9  ;;  %1672 = vmatprep.mubr.msk.bf16.mxu1 %vm536_vm0, %v1863_v10  ;;  %s2637_s22 = sld [smem:[#allocation33_spill]]  ;;  %s2045_s11 = scalar_lea.vmem %s2544_s9, 128 }
  0x8f   : > { %v685_v3 = vld [vmem:[%s2633_s16] sm:$0xf]  ;;  %1682 = vmatprep.subr.bf16.mxu1 %v2151_v12  ;;  %p2046_p3 = scmp.ne.s32.totalorder %s2544_s9, %s2045_s11  ;;  %s2153_s18 = smov [#allocation15]  }
  0x90   : > { %1756 = vmatprep.subr.msk.bf16.mxu0 %vm536_vm0, %v685_v3  ;;  %v704_v6 = vsel %vm536_vm0, %v685_v3, 0  ;;  %s2049_s28 = sshll.u32 %s2153_s18, 4  ;;  %s2050_s28 = int_to_ptr.vmem [resolvable:$false] %s2049_s28 }
  0x91   : > { %s1625_s29 = sshll.u32 %s2634_s15, 7  ;;  %s2051_s17 = scalar_lea.vmem %s2050_s28, 256 }
  0x92   : > { %1667 = vmatmul.mubr.msk.bf16.vlgmr.msra.gmra.mxu0 %vm536_vm0, %v1860_v4  ;;  %p2052_p7 = scmp.lt.s32.totalorder %s2544_s9, %s2050_s28  ;;  %p2053_p2 = scmp.lt.s32.totalorder %s2051_s17, %s2045_s11 }
  0x93   : > { %1677 = vmatpush3.bf16.xpose.msra.mxu0 %v704_v6  ;;  %1678 = vmatprep.mubr.msk.bf16.mxu0 %vm536_vm0, %v1861_v5  ;;  %p2638_p13 = scmp.ne.s32.totalorder %s2636_s21, 0 }
  0x94   : > { %1688 = vmatprep.subr.bf16.mxu0 %v2151_v12  ;;  %s2542_s25 = scalar_lea.hbm %s2637_s22, %s1625_s29  ;;  %p2054_p9 = por %p2053_p2, %p2052_p7 }
  0x95   : > { %1673 = vmatmul.mubr.msk.bf16.vlgmr.msra.gmra.mxu1 %vm536_vm0, %v1864_v11  ;;  %p2047_p4 = pnand %p2046_p3, %p2638_p13 }
  0x96   : > { %1684 = vmatprep.mubr.msk.bf16.mxu1 %vm2152_vm1, %v2151_v12 }
  0x97   : > { %p2048_p1 = pneg %p2047_p4 }
  0x99   : > { %p2055_p12 = pnand %p2054_p9, %p2048_p1 }
  0x9a   : > { %1679 = vmatmul.mubr.msk.bf16.vlgmr.msra.gmra.mxu0 %vm536_vm0, %v1862_v7 }
  0x9b   : > { %1690 = vmatprep.mubr.msk.bf16.mxu0 %vm2152_vm1, %v2151_v12 }
 0x152   : > { %v1668_v13 = vpop.f32.mrf.mxu0 }
 0x153   : > { %v597_v14 = vpack.c.bf16 %v1668_v13, %v1668_v13 }
 0x154   : > { %v580_v15 = vpop.f32.mrf.mxu0 }
 0x155   : > { %602 = vst.msk [vmem:[#allocation2 + $0x8] sm:$0xf] %vm599_vm2, %v597_v14  ;;  %v595_v16 = vpack.c.bf16 %v580_v15, %v580_v15  ;;  %v1674_v37 = vpop.f32.mrf.mxu1 }
 0x156   : > { %v1669_v17 = vpop.f32.mrf.mxu0  ;;  %v675_v38 = vpack.c.bf16 %v1674_v37, %v1674_v37 }
 0x157   : > { %600 = vst.msk [vmem:[#allocation2] sm:$0xf] %vm599_vm2, %v595_v16  ;;  %v598_v18 = vpack.c.bf16 %v1669_v17, %v1669_v17  ;;  %v658_v39 = vpop.f32.mrf.mxu1 }
 0x158   : > { %v583_v19 = vpop.f32.mrf.mxu0  ;;  %679 = vst.msk [vmem:[#allocation3 + $0x8] sm:$0xf] %vm599_vm2, %v675_v38  ;;  %v673_v40 = vpack.c.bf16 %v658_v39, %v658_v39  ;;  %v1189_v39 = vld [vmem:[#allocation13] sm:$0xf] }
 0x159   : > { %603 = vst.msk [vmem:[#allocation2 + $0xc] sm:$0xf] %vm599_vm2, %v598_v18  ;;  %v596_v20 = vpack.c.bf16 %v583_v19, %v583_v19  ;;  %v1675_v41 = vpop.f32.mrf.mxu1 }
 0x15a   : > { %v1680_v21 = vpop.f32.mrf.mxu0  ;;  %677 = vst.msk [vmem:[#allocation3] sm:$0xf] %vm599_vm2, %v673_v40  ;;  %v676_v42 = vpack.c.bf16 %v1675_v41, %v1675_v41  ;;  %v1242_v40 = vsel %vm995_vm3, %v1189_v39, 0  ;;  %v1191_v41 = vld [vmem:[#allocation13 + $0x4] sm:$0xf] }
 0x15b   : > { %601 = vst.msk [vmem:[#allocation2 + $0x4] sm:$0xf] %vm599_vm2, %v596_v20  ;;  %v757_v35 = vpack.c.bf16 %v1680_v21, %v1680_v21  ;;  %v661_v43 = vpop.f32.mrf.mxu1 }
 0x15c   : > { %v740_v22 = vpop.f32.mrf.mxu0  ;;  %v761_v28 = vld [vmem:[#allocation2 + $0x8] sm:$0xf]  ;;  %680 = vst.msk [vmem:[#allocation3 + $0xc] sm:$0xf] %vm599_vm2, %v676_v42  ;;  %v674_v44 = vpack.c.bf16 %v661_v43, %v661_v43  ;;  %v1196_v42 = vsel %vm995_vm3, %v1191_v41, 0 }
 0x15d   : > { %v755_v29 = vpack.c.bf16 %v740_v22, %v740_v22  ;;  %v860_v31 = vsel %vm536_vm0, %v761_v28, 0 }
 0x15e   : > { %v759_v23 = vld [vmem:[#allocation2] sm:$0xf]  ;;  %v1681_v25 = vpop.f32.mrf.mxu0  ;;  %678 = vst.msk [vmem:[#allocation3 + $0x4] sm:$0xf] %vm599_vm2, %v674_v44 }
 0x15f   : > { %v768_v24 = vsel %vm536_vm0, %v759_v23, 0  ;;  %v758_v36 = vpack.c.bf16 %v1681_v25, %v1681_v25 }
 0x160   : > { %1683 = vmatpush3.bf16.xpose.msra.mxu1 %v768_v24  ;;  %v743_v30 = vpop.f32.mrf.mxu0  ;;  %v762_v32 = vld [vmem:[#allocation2 + $0xc] sm:$0xf]  ;;  %v990_v24 = vld [vmem:[#allocation3 + $0x8] sm:$0xf] }
 0x161   : > { %1694 = vmatprep.subr.bf16.mxu1 %v2151_v12  ;;  %v756_v33 = vpack.c.bf16 %v743_v30, %v743_v30  ;;  %v906_v34 = vsel %vm536_vm0, %v762_v32, 0  ;;  %v988_v45 = vld [vmem:[#allocation3] sm:$0xf] }
 0x162   : > { %v760_v26 = vld [vmem:[#allocation2 + $0x4] sm:$0xf]  ;;  %v997_v47 = vsel %vm995_vm3, %v988_v45, 0 }
 0x163   : > { %v814_v27 = vsel %vm536_vm0, %v760_v26, 0 }
 0x164   : > { %1689 = vmatpush3.bf16.xpose.msra.mxu0 %v814_v27  ;;  %v1089_v27 = vsel %vm995_vm3, %v990_v24, 0 }
 0x165   : > { %1700 = vmatprep.subr.bf16.mxu0 %v2151_v12  ;;  %v989_v46 = vld [vmem:[#allocation3 + $0x4] sm:$0xf] }
 0x166   : > { %v1043_v48 = vsel %vm995_vm3, %v989_v46, 0 }
 0x167   : > { %1685 = vmatmul.mubr.msk.bf16.vlgmr.msra.gmra.mxu1 %vm536_vm0, %v755_v29  ;;  %v991_v29 = vld [vmem:[#allocation3 + $0xc] sm:$0xf] }
 0x168   : > { %1695 = vmatpush3.bf16.xpose.msra.mxu1 %v860_v31  ;;  %1696 = vmatprep.mubr.msk.bf16.mxu1 %vm2152_vm1, %v2151_v12  ;;  %v1135_v32 = vsel %vm995_vm3, %v991_v29, 0 }
 0x169   : > { %1706 = vmatprep.subr.bf16.mxu1 %v2151_v12 }
 0x16b   : > { %1691 = vmatmul.mubr.msk.bf16.vlgmr.msra.gmra.mxu0 %vm536_vm0, %v756_v33 }
 0x16c   : > { %1701 = vmatpush3.bf16.xpose.msra.mxu0 %v906_v34  ;;  %1702 = vmatprep.mubr.msk.bf16.mxu0 %vm2152_vm1, %v2151_v12 }
 0x16d   : > { %1712 = vmatprep.subr.bf16.mxu0 %v2151_v12 }
 0x16f   : > { %1697 = vmatmul.mubr.msk.bf16.vlgmr.msra.gmra.mxu1 %vm536_vm0, %v757_v35 }
 0x170   : > { %1708 = vmatprep.mubr.msk.bf16.mxu1 %vm2152_vm1, %v2151_v12  ;;  %1707 = vmatpush3.bf16.msra.mxu1 %v997_v47 }
 0x171   : > { %1718 = vmatprep.subr.bf16.mxu1 %v2151_v12 }
 0x173   : > { %1703 = vmatmul.mubr.msk.bf16.vlgmr.msra.gmra.mxu0 %vm536_vm0, %v758_v36 }
 0x174   : > { %1714 = vmatprep.mubr.msk.bf16.mxu0 %vm2152_vm1, %v2151_v12  ;;  %1713 = vmatpush3.bf16.msra.mxu0 %v1043_v48 }
 0x175   : > { %1724 = vmatprep.subr.bf16.mxu0 %v2151_v12 }
 0x227   : > { %v804_v50 = vpop.f32.mrf.mxu1 }
 0x228   : > { %v805_v51 = vadd.f32 %v804_v50, %v763_v49 }
 0x229   : > { %v1686_v52 = vpop.f32.mrf.mxu1 }
 0x22a   : > { %v948_v53 = vsel %vm536_vm0, %v805_v51, -inf }
 0x22b   : > { %949 = vmax.xlane.f32.xlu0 %v948_v53  ;;  %v807_v54 = vpop.f32.mrf.mxu1  ;;  %v850_v55 = vpop.f32.mrf.mxu0 }
 0x22c   : > { %v851_v56 = vadd.f32 %v850_v55, %v763_v49 }
 0x22d   : > { %v1687_v57 = vpop.f32.mrf.mxu1  ;;  %v1692_v58 = vpop.f32.mrf.mxu0 }
 0x22e   : > { %v951_v59 = vsel %vm536_vm0, %v851_v56, -inf  ;;  %v1285_v57 = vld [vmem:[#allocation13 + $0x8] sm:$0xf] }
 0x22f   : > { %v896_v60 = vpop.f32.mrf.mxu1  ;;  %952 = vmax.xlane.f32.xlu0 %v951_v59  ;;  %v853_v61 = vpop.f32.mrf.mxu0 }
 0x230   : > { %v897_v62 = vadd.f32 %v896_v60, %v763_v49 }
 0x231   : > { %v1693_v63 = vpop.f32.mrf.mxu0  ;;  %v1698_v0 = vpop.f32.mrf.mxu1 }
 0x232   : > { %v954_v1 = vsel %vm536_vm0, %v897_v62, -inf }
 0x233   : > { %955 = vmax.xlane.f32.xlu1 %v954_v1  ;;  %v899_v2 = vpop.f32.mrf.mxu1  ;;  %v942_v3 = vpop.f32.mrf.mxu0 }
 0x234   : > { %v943_v4 = vadd.f32 %v942_v3, %v763_v49  ;;  %v1334_v49 = vld [vmem:[#allocation13 + $0xc] sm:$0xf] }
 0x235   : > { %v1699_v5 = vpop.f32.mrf.mxu1  ;;  %v1704_v6 = vpop.f32.mrf.mxu0  ;;  %v1339_v53 = vsel %vm995_vm3, %v1334_v49, 0 }
 0x236   : > { %v957_v7 = vsel %vm536_vm0, %v943_v4, -inf }
 0x237   : > { %958 = vmax.xlane.f32.xlu1 %v957_v7  ;;  %v945_v8 = vpop.f32.mrf.mxu0 }
 0x239   : > { %v1705_v9 = vpop.f32.mrf.mxu0 }
 0x2b4   : > { %v950_v10 = vpop.xlane.xlu0 %949 }
 0x2b5   : > { %v960_v11 = vsub.f32 %v805_v51, %v950_v10 }
 0x2b7   : > { %v964_v13 = vmul.f32 1.442695, %v960_v11 }
 0x2b8   : > { %v953_v14 = vpop.xlane.xlu0 %952 }
 0x2b9   : > { %1865 = vpow2.f32 %v964_v13  ;;  %v961_v15 = vsub.f32 %v851_v56, %v953_v14 }
 0x2bb   : > { %v966_v16 = vmul.f32 1.442695, %v961_v15 }
 0x2bc   : > { %v956_v17 = vpop.xlane.xlu1 %955 }
 0x2bd   : > { %1867 = vpow2.f32 %v966_v16  ;;  %v962_v18 = vsub.f32 %v897_v62, %v956_v17  ;;  %v1290_v62 = vsel %vm995_vm3, %v1285_v57, 0 }
 0x2bf   : > { %v968_v19 = vmul.f32 1.442695, %v962_v18 }
 0x2c0   : > { %v959_v20 = vpop.xlane.xlu1 %958 }
 0x2c1   : > { %1869 = vpow2.f32 %v968_v19  ;;  %v963_v21 = vsub.f32 %v943_v4, %v959_v20 }
 0x2c3   : > { %v970_v22 = vmul.f32 1.442695, %v963_v21 }
 0x2c5   : > { %1871 = vpow2.f32 %v970_v22 }
 0x2c6   : > { %v1866_v23 = vpop.eup %1865 }
 0x2c7   : > { %v972_v25 = vsel %vm536_vm0, %v1866_v23, 0.0  ;;  %v984_v26 = vpack.c.bf16 %v1866_v23, %v1866_v23 }
 0x2c8   : > { %973 = vadd.xlane.f32.xlu1 %v972_v25 }
 0x2c9   : > { %1709 = vmatmul.mubr.msk.bf16.vlgmr.msra.gmra.mxu1 %vm536_vm0, %v984_v26 }
 0x2ca   : > { %v1868_v28 = vpop.eup %1867  ;;  %1719 = vmatpush3.bf16.msra.mxu1 %v1089_v27  ;;  %1720 = vmatprep.mubr.msk.bf16.mxu1 %vm2152_vm1, %v2151_v12  ;;  %v1623_v27 = vld [vmem:[%s2635_s26] ss:$0 sm:$0xff] }
 0x2cb   : > { %v975_v30 = vsel %vm536_vm0, %v1868_v28, 0.0  ;;  %v985_v31 = vpack.c.bf16 %v1868_v28, %v1868_v28  ;;  %1730 = vmatprep.subr.bf16.mxu1 %v2151_v12 }
 0x2cc   : > { %976 = vadd.xlane.f32.xlu0 %v975_v30 }
 0x2cd   : > { %1715 = vmatmul.mubr.msk.bf16.vlgmr.msra.gmra.mxu0 %vm536_vm0, %v985_v31 }
 0x2ce   : > { %v1870_v33 = vpop.eup %1869  ;;  %1725 = vmatpush3.bf16.msra.mxu0 %v1135_v32  ;;  %1726 = vmatprep.mubr.msk.bf16.mxu0 %vm2152_vm1, %v2151_v12 }
 0x2cf   : > { %v978_v34 = vsel %vm536_vm0, %v1870_v33, 0.0  ;;  %v986_v35 = vpack.c.bf16 %v1870_v33, %v1870_v33  ;;  %1736 = vmatprep.subr.bf16.mxu0 %v2151_v12 }
 0x2d0   : > { %979 = vadd.xlane.f32.xlu0 %v978_v34 }
 0x2d1   : > { %1721 = vmatmul.mubr.msk.bf16.vlgmr.msra.gmra.mxu1 %vm536_vm0, %v986_v35 }
 0x2d2   : > { %v1872_v36 = vpop.eup %1871  ;;  %1732 = vmatprep.mubr.msk.bf16.mxu1 %vm2152_vm1, %v2151_v12  ;;  %1731 = vmatpush3.bf16.msra.mxu1 %v1196_v42 }
 0x2d3   : > { %v981_v37 = vsel %vm536_vm0, %v1872_v36, 0.0  ;;  %v987_v38 = vpack.c.bf16 %v1872_v36, %v1872_v36  ;;  %1742 = vmatprep.subr.bf16.mxu1 %v2151_v12 }
 0x2d4   : > { %982 = vadd.xlane.f32.xlu1 %v981_v37 }
 0x2d5   : > { %1727 = vmatmul.mubr.msk.bf16.vlgmr.msra.gmra.mxu0 %vm536_vm0, %v987_v38 }
 0x2d6   : > { %1738 = vmatprep.mubr.msk.bf16.mxu0 %vm2152_vm1, %v2151_v12  ;;  %1737 = vmatpush3.bf16.msra.mxu0 %v1242_v40 }
 0x2d7   : > { %1748 = vmatprep.subr.bf16.mxu0 %v2151_v12 }
 0x351   : > { %v974_v43 = vpop.xlane.xlu1 %973 }
 0x352   : > { %1873 = vrcp.f32 %v974_v43 }
 0x355   : > { %v977_v44 = vpop.xlane.xlu0 %976 }
 0x356   : > { %1875 = vrcp.f32 %v977_v44 }
 0x359   : > { %v980_v45 = vpop.xlane.xlu0 %979 }
 0x35a   : > { %1877 = vrcp.f32 %v980_v45 }
 0x35d   : > { %v983_v46 = vpop.xlane.xlu1 %982 }
 0x35e   : > { %1879 = vrcp.f32 %v983_v46 }
 0x35f   : > { %v1874_v47 = vpop.eup %1873 }
 0x363   : > { %v1876_v54 = vpop.eup %1875 }
 0x367   : > { %v1878_v1 = vpop.eup %1877 }
 0x36b   : > { %v1880_v5 = vpop.eup %1879 }
 0x389   : > { %v1033_v48 = vpop.f32.mrf.mxu1 }
 0x38a   : > { %v1181_v50 = vmul.f32 %v1874_v47, %v1033_v48 }
 0x38b   : > { %v1710_v51 = vpop.f32.mrf.mxu1 }
 0x38c   : > { %v1185_v52 = vpack.c.bf16 %v1181_v50, %v1181_v50 }
 0x38d   : > { %v1036_v55 = vpop.f32.mrf.mxu1  ;;  %v1079_v56 = vpop.f32.mrf.mxu0 }
 0x38e   : > { %v1182_v58 = vmul.f32 %v1876_v54, %v1079_v56  ;;  %1739 = vmatmul.mubr.msk.bf16.vlgmr.msra.gmra.mxu0 %vm536_vm0, %v1185_v52 }
 0x38f   : > { %v1711_v59 = vpop.f32.mrf.mxu1  ;;  %v1716_v60 = vpop.f32.mrf.mxu0  ;;  %1749 = vmatpush3.bf16.msra.mxu0 %v1339_v53  ;;  %1750 = vmatprep.mubr.msk.bf16.mxu0 %vm2152_vm1, %v2151_v12 }
 0x390   : > { %v1186_v61 = vpack.c.bf16 %v1182_v58, %v1182_v58 }
 0x391   : > { %v1082_v63 = vpop.f32.mrf.mxu0  ;;  %v1125_v0 = vpop.f32.mrf.mxu1 }
 0x392   : > { %1733 = vmatmul.mubr.msk.bf16.vlgmr.msra.gmra.mxu1 %vm536_vm0, %v1186_v61  ;;  %v1183_v4 = vmul.f32 %v1878_v1, %v1125_v0 }
 0x393   : > { %v1717_v2 = vpop.f32.mrf.mxu0  ;;  %v1722_v3 = vpop.f32.mrf.mxu1  ;;  %1743 = vmatpush3.bf16.msra.mxu1 %v1290_v62  ;;  %1744 = vmatprep.mubr.msk.bf16.mxu1 %vm2152_vm1, %v2151_v12 }
 0x394   : > { %v1187_v11 = vpack.c.bf16 %v1183_v4, %v1183_v4 }
 0x395   : > { %v1128_v6 = vpop.f32.mrf.mxu1  ;;  %v1171_v7 = vpop.f32.mrf.mxu0 }
 0x396   : > { %v1184_v8 = vmul.f32 %v1880_v5, %v1171_v7 }
 0x397   : > { %v1723_v9 = vpop.f32.mrf.mxu1  ;;  %v1728_v10 = vpop.f32.mrf.mxu0 }
 0x398   : > { %v1188_v13 = vpack.c.bf16 %v1184_v8, %v1184_v8 }
 0x399   : > { %v1174_v14 = vpop.f32.mrf.mxu0 }
 0x39a   : > { %1745 = vmatmul.mubr.msk.bf16.vlgmr.msra.gmra.mxu1 %vm536_vm0, %v1187_v11  ;;  %1751 = vmatmul.mubr.msk.bf16.vlgmr.msra.gmra.mxu0 %vm536_vm0, %v1188_v13 }
 0x39b   : > { %v1729_v15 = vpop.f32.mrf.mxu0 }
 0x44e   : > { %v1278_v16 = vpop.f32.mrf.mxu0 }
 0x450   : > { %v1740_v17 = vpop.f32.mrf.mxu0 }
 0x452   : > { %v1232_v12 = vpop.f32.mrf.mxu1  ;;  %v1281_v18 = vpop.f32.mrf.mxu0 }
 0x453   : > { %v1279_v23 = vadd.f32 %v1278_v16, %v1232_v12 }
 0x454   : > { %v1734_v19 = vpop.f32.mrf.mxu1  ;;  %v1741_v20 = vpop.f32.mrf.mxu0 }
 0x456   : > { %v1235_v21 = vpop.f32.mrf.mxu1 }
 0x458   : > { %v1735_v22 = vpop.f32.mrf.mxu1 }
 0x45a   : > { %v1326_v24 = vpop.f32.mrf.mxu1  ;;  %v1375_v25 = vpop.f32.mrf.mxu0 }
 0x45b   : > { %v1332_v26 = vadd.f32 %v1326_v24, %v1279_v23 }
 0x45c   : > { %v1746_v28 = vpop.f32.mrf.mxu1  ;;  %v1752_v29 = vpop.f32.mrf.mxu0 }
 0x45d   : > { %v1381_v30 = vadd.f32 %v1375_v25, %v1332_v26 }
 0x45e   : > { %v1329_v31 = vpop.f32.mrf.mxu1  ;;  %v1378_v32 = vpop.f32.mrf.mxu0 }
 0x45f   : > { %v1389_v33 = vadd.f32 %v1623_v27, %v1381_v30 }
 0x460   : > { %v1747_v34 = vpop.f32.mrf.mxu1  ;;  %v1753_v35 = vpop.f32.mrf.mxu0 }
 0x461   : > { %1391 = vst.msk [vmem:[%s511_s1] sm:$0xff] %vm1390_vm4, %v1389_v33 }
 0x462   : > { %2058 = shalt.err (!%p2055_p12)
}
 0x463   : > { %s2059_s24 = scalar_lea.hbm %s2542_s25, 128  ;;  %s2063_s19 = scalar_lea.hbm %s2637_s22, 256 }
 0x464   : > { %p2060_p6 = scmp.ne.s32.totalorder %s2542_s25, %s2059_s24  ;;  %p2064_p5 = scmp.lt.s32.totalorder %s2542_s25, %s2637_s22 }
 0x465   : > { %p2065_p10 = scmp.lt.s32.totalorder %s2063_s19, %s2059_s24 }
 0x466   : > { %p2061_p0 = pnand %p2060_p6, %p2638_p13 }
 0x467   : > { %p2066_p8 = por %p2065_p10, %p2064_p5 }
 0x468   : > { %p2062_p11 = pneg %p2061_p0 }
 0x46a   : > { %p2067_p3 = pnand %p2066_p8, %p2062_p11 }
 0x46c   : > { %2070 = shalt.err (!%p2067_p3)
}
 0x46d   : > { %1773 = dma.vmem_to_hbm [thread:$0]  (%p2638_p13), %s2544_s9, 128, %s2542_s25, %s1393_s20  }
 0x46e PF: > { %s2639_s15 = sld [smem:[#allocation22_spill]]  ;;  %p2642_p1 = scmp.ge.s32.totalorder %s2141_s14, 2 }
 0x46f   : > { %s2640_s6 = sld [smem:[#allocation26_spill]] }
 0x474   : > { %s1419_s4 = sand.u32 1, %s2639_s15  }
 0x475   : > { %p2641_p4 = scmp.ne.s32.totalorder %s2640_s6, 0  ;;  %s1420_s26 = scalar_lea.sflag [#allocation6], %s1419_s4 }
 0x477   : > { %p1796_p7 = pnand %p2642_p1, %p2641_p4 }
 0x479   : > { %p1797_p2 = pneg %p1796_p7 }
 0x47b   : > { %2116 = dma.done.wait (%p1797_p2), %s1420_s26, 128  }
 0x47c   : > { %2118 = vsyncadd (%p1797_p2), %s1420_s26, 4294967168  ;;  %s32_s14 = sadd.s32 1, %s2141_s14   ;;  %s2643_s29 = sld [smem:[#allocation23_spill]] }
 0x47d   : > { %p29_p9 = scmp.ge.s32.totalorder %s32_s14, 4   ;;  %s2644_s11 = sld [smem:[#allocation28_spill]] }
 0x47e   : > { %s2645_s21 = sld [smem:[#allocation27_spill]]  ;;  %s2646_s30 = smov %s2125_s10 }
 0x47f   : > { %s2648_s12 = smov %s2137_s13 }
 0x480   :  { %31 = sbr.rel (!%p29_p9) target bundleno = 17 (0x11), region = 153 }
 0x482   : > { %s2647_s10 = smov %s2643_s29 }
 0x484   : > { %s2649_s13 = smov %s2645_s21 }
 0x485   :  { %1425 = vsyncpa [#allocation5], 1 }
 0x486   :  { %1427 = vsyncpa [#allocation5 + $0x1], 1 }
 0x487   :  { %1428 = vsyncpa [#allocation8], 1 }
 0x488   :  { %1430 = vsyncpa [#allocation8 + $0x1], 1 }
 0x489   :  { %1431 = vsyncpa [#allocation11], 1 }
 0x48a   :  { %1433 = vsyncpa [#allocation11 + $0x1], 1 }
 0x48b   :  { %1434 = vsyncpa [#allocation14], 1 }
 0x48c   :  { %1435 = vsyncpa [#allocation6], 1 }
 0x48d   :  { %1437 = vsyncpa [#allocation6 + $0x1], 1 }

</bundles_post_ra>
